<compile_context>
chip_gen: v5e
topology: v5e:2x2
jax: 0.10.0
libtpu: 0.0.40
codegen_flags: <defaults>
</compile_context>

<pallas_src>
import jax
import jax.numpy as jnp
from jax.experimental import pallas as pl
from jax.experimental.pallas import tpu as pltpu


def _embed_kernel(x_ref, w_ref, pos_ref, o_ref):
    # x_ref:   (TM, K)   flattened patches (rows of the B*n_patches axis)
    # w_ref:   (K, TN)   flattened patch-embedding weight column tile
    # pos_ref: (TM, TN)  position embedding with conv bias folded in (f32)
    # o_ref:   (TM, TN)  output tile
    acc = jnp.dot(x_ref[...], w_ref[...], preferred_element_type=jnp.float32)
    o_ref[...] = (acc + pos_ref[...]).astype(o_ref.dtype)


def _pick_tile(dim, align, target):
    """Largest multiple of `align` that divides `dim` and is <= target (None if none)."""
    t = min(target, dim)
    t -= t % align
    while t >= align:
        if dim % t == 0:
            return t
        t -= align
    return None


def embeddings_forward(x, conv_w, conv_b, pos_emb, patch_size,
                       matmul_dtype=jnp.bfloat16, out_dtype=None,
                       row_tile_target=1024, col_tile_target=None):
    """ViT `Embeddings.forward` (non-hybrid path).

    x:        (B, C, H, W)  NCHW, like the PyTorch Conv2d input
    conv_w:   (hidden, C, p, p)  PyTorch Conv2d weight layout (OIHW)
    conv_b:   (hidden,)
    pos_emb:  (1, n_patches, hidden)
    returns (embeddings (B, n_patches, hidden), features=None)
    """
    B, C, H, W = x.shape
    p = patch_size
    hidden = conv_w.shape[0]
    hp, wp = H // p, W // p
    n_patches = hp * wp
    K = C * p * p
    M = B * n_patches
    out_dtype = x.dtype if out_dtype is None else out_dtype

    # Glue: non-overlapping patch extraction -> (B*n_patches, C*p*p), row-major
    # over (b, h', w'), matching `conv(stride=p) -> flatten(2) -> transpose`.
    # Materialized once in HBM (one XLA transpose+cast fusion) so the kernel
    # streams contiguous tiles; no allow_input_fusion.
    patches = x.reshape(B, C, hp, p, wp, p)
    patches = patches.transpose(0, 2, 4, 1, 3, 5).reshape(M, K)
    patches = patches.astype(matmul_dtype)

    # Flatten conv weight (OIHW) -> (K, hidden):
    #   out[o] = sum_{c,i,j} w[o,c,i,j] * patch[c,i,j]
    w_flat = conv_w.reshape(hidden, K).T.astype(matmul_dtype)

    # Fold the conv bias into the position embedding (drops one VMEM operand
    # and one VPU add per element inside the kernel).
    pos_b = (pos_emb.reshape(n_patches, hidden)
             + conv_b[None, :]).astype(jnp.float32)

    m_isz = jnp.dtype(matmul_dtype).itemsize
    o_isz = jnp.dtype(out_dtype).itemsize
    sub_align = 8 if m_isz >= 4 else 16

    # --- Row tiling ----------------------------------------------------
    # Primary path: TM = (multiple of n_patches) that (a) is sublane-aligned,
    # (b) divides M via a divisor of B, and (c) is <= row_tile_target.  Then
    # pos only needs shape (TM, hidden) and index map (0, j): VMEM-resident
    # across all row iterations.
    TM = None
    c0 = None
    for cand in range(1, B + 1):
        if (cand * n_patches) % sub_align == 0 and B % cand == 0:
            c0 = cand
            break
    if c0 is not None and c0 * n_patches <= max(row_tile_target, c0 * n_patches):
        best = c0
        k = 2
        while k * c0 <= B:
            kc = k * c0
            if kc * n_patches > row_tile_target:
                break
            if B % kc == 0:
                best = kc
            k += 1
        if best * n_patches <= max(row_tile_target, c0 * n_patches):
            TM = best * n_patches
            pos_arr = jnp.tile(pos_b, (best, 1)) if best > 1 else pos_b
            pos_index = lambda j, i: (0, j)

    if TM is None:
        # Rare safety net (no usable batch divisor for alignment): replicate
        # pos across batch so any legal row tiling of M works.
        TM = _pick_tile(M, sub_align, row_tile_target) or M
        pos_arr = jnp.broadcast_to(
            pos_b[None], (B, n_patches, hidden)).reshape(M, hidden)
        pos_index = lambda j, i: (i, j)

    # --- Column tiling ---------------------------------------------------
    # Default: full hidden (weight tile is small), so grid_n == 1 and the
    # patches operand is read from HBM exactly once.
    if col_tile_target is None:
        TN = hidden
    else:
        TN = _pick_tile(hidden, 128, col_tile_target) or hidden

    grid_n = hidden // TN
    grid_m = M // TM

    # Explicit VMEM budget (double-buffered working set + headroom); safe on
    # v7x's 64 MiB and gives v5e/v6e room for the larger tiles.
    vmem_need = 2 * (TM * K * m_isz + K * TN * m_isz
                     + TM * TN * 4 + TM * TN * o_isz)
    vmem_limit = int(min(max(int(vmem_need * 1.3), 32 * 1024 * 1024),
                         56 * 1024 * 1024))

    cost = pl.CostEstimate(
        flops=2 * M * K * hidden,
        transcendentals=0,
        bytes_accessed=(patches.size * m_isz + w_flat.size * m_isz
                        + pos_arr.size * 4 + M * hidden * o_isz),
    )

    # TODO(synk): self.DAblock1 = CPCA(768, 768) has no definition in the
    # provided source; it is skipped (treated as identity) here.
    # Dropout is identity in eval/inference mode (no RNG applied).

    out = pl.pallas_call(
        _embed_kernel,
        out_shape=jax.ShapeDtypeStruct((M, hidden), out_dtype),
        grid_spec=pltpu.PrefetchScalarGridSpec(
            num_scalar_prefetch=0,
            # hidden tiles OUTER so the weight column tile stays resident
            # across all row (inner) iterations.
            grid=(grid_n, grid_m),
            in_specs=[
                pl.BlockSpec((TM, K), lambda j, i: (i, 0)),
                pl.BlockSpec((K, TN), lambda j, i: (0, j)),
                pl.BlockSpec((TM, TN), pos_index),
            ],
            out_specs=pl.BlockSpec((TM, TN), lambda j, i: (i, j)),
        ),
        compiler_params=pltpu.CompilerParams(
            dimension_semantics=("parallel", "parallel"),
            vmem_limit_bytes=vmem_limit,
        ),
        cost_estimate=cost,
    )(patches, w_flat, pos_arr)

    embeddings = out.reshape(B, n_patches, hidden)
    features = None
    return embeddings, features


def _jax_reference(x, conv_w, conv_b, pos_emb, p):
    B, C, H, W = x.shape
    hidden = conv_w.shape[0]
    n_patches = (H // p) * (W // p)
    ref = jax.lax.conv_general_dilated(
        x, conv_w, window_strides=(p, p), padding="VALID",
        dimension_numbers=("NCHW", "OIHW", "NCHW"))
    ref = ref + conv_b.reshape(1, hidden, 1, 1)
    return ref.reshape(B, hidden, n_patches).transpose(0, 2, 1) + pos_emb


if __name__ == "__main__":
    # Small shapes consistent with the module's forward:
    #   batch=2, in_channels=4, img=16x16, patch_size=4 -> n_patches=16,
    #   hidden_size=32.
    B, C, H, W = 2, 4, 16, 16
    p = 4
    hidden = 32
    hp, wp = H // p, W // p
    n_patches = hp * wp

    key = jax.random.PRNGKey(0)
    kx, kw, kb, kp = jax.random.split(key, 4)
    x = jax.random.normal(kx, (B, C, H, W), dtype=jnp.float32)
    conv_w = jax.random.normal(kw, (hidden, C, p, p), dtype=jnp.float32) * 0.05
    conv_b = jax.random.normal(kb, (hidden,), dtype=jnp.float32) * 0.05
    # nn.Parameter(torch.zeros(1, n_patches, hidden)) in __init__; use small
    # deterministic values so the add is actually exercised.
    pos_emb = jax.random.normal(kp, (1, n_patches, hidden), dtype=jnp.float32) * 0.02

    ref = _jax_reference(x, conv_w, conv_b, pos_emb, p)

    # 1) f32 matmul path: tight check against the conv reference.
    emb32, feats = embeddings_forward(x, conv_w, conv_b, pos_emb, p,
                                      matmul_dtype=jnp.float32)
    emb32 = jax.block_until_ready(emb32)
    assert emb32.shape == (B, n_patches, hidden)
    assert feats is None
    assert jnp.allclose(emb32, ref, atol=1e-4, rtol=1e-4), "f32 mismatch vs ref"

    # 2) Default bf16 MXU path (f32 accumulation): looser tolerance for the
    #    bf16 input rounding.
    emb, feats = embeddings_forward(x, conv_w, conv_b, pos_emb, p)
    emb = jax.block_until_ready(emb)
    assert emb.shape == (B, n_patches, hidden)
    assert feats is None
    assert jnp.allclose(emb, ref, atol=2e-2, rtol=2e-2), "bf16 mismatch vs ref"

    # 3) Multi-row-tile grid (TM = n_patches, grid_m = B) to exercise the
    #    VMEM-resident pos indexing (0, j) across several row iterations.
    emb_mt, _ = embeddings_forward(x, conv_w, conv_b, pos_emb, p,
                                   row_tile_target=n_patches)
    emb_mt = jax.block_until_ready(emb_mt)
    assert jnp.allclose(emb_mt, ref, atol=2e-2, rtol=2e-2), "tiled mismatch vs ref"

    # 4) Unaligned n_patches with no usable batch divisor -> safety-net path.
    H2 = W2 = 24  # n_patches = 36 (not a multiple of 16), B=1
    x2 = jax.random.normal(kx, (1, C, H2, W2), dtype=jnp.float32)
    np2 = (H2 // p) * (W2 // p)
    pos2 = jax.random.normal(kp, (1, np2, hidden), dtype=jnp.float32) * 0.02
    ref2 = _jax_reference(x2, conv_w, conv_b, pos2, p)
    emb2, _ = embeddings_forward(x2, conv_w, conv_b, pos2, p)
    emb2 = jax.block_until_ready(emb2)
    assert emb2.shape == (1, np2, hidden)
    assert jnp.allclose(emb2, ref2, atol=2e-2, rtol=2e-2), "fallback mismatch vs ref"

    print("KERNEL_OK")
</pallas_src>

<mosaic_0001>
module attributes {stable_mosaic.version = 11 : i64} {
  func.func @_embed_kernel(%arg0: i32, %arg1: i32, %arg2: memref<32x64xf32, #tpu.memory_space<vmem>>, %arg3: memref<64x32xf32, #tpu.memory_space<vmem>>, %arg4: memref<32x32xf32, #tpu.memory_space<vmem>>, %arg5: memref<32x32xf32, #tpu.memory_space<vmem>>) attributes {dimension_semantics = [#tpu.dimension_semantics<parallel>, #tpu.dimension_semantics<parallel>], iteration_bounds = array<i64: 1, 1>, scalar_prefetch = 0 : i64, scratch_operands = 0 : i64, tpu.core_type = #tpu.core_type<tc>, window_params = [{transform_indices = @transform_0, window_bounds = array<i64: 32, 64>}, {transform_indices = @transform_1, window_bounds = array<i64: 64, 32>}, {transform_indices = @transform_2, window_bounds = array<i64: 32, 32>}, {transform_indices = @transform_3, window_bounds = array<i64: 32, 32>}]} {
    %c0 = arith.constant 0 : index
    %c0_0 = arith.constant 0 : index
    %0 = vector.load %arg2[%c0, %c0_0] : memref<32x64xf32, #tpu.memory_space<vmem>>, vector<32x64xf32>
    %c0_1 = arith.constant 0 : index
    %c0_2 = arith.constant 0 : index
    %1 = vector.load %arg3[%c0_1, %c0_2] : memref<64x32xf32, #tpu.memory_space<vmem>>, vector<64x32xf32>
    %cst = arith.constant dense<0.000000e+00> : vector<32x32xf32>
    %2 = tpu.matmul %0, %1, %cst {dimension_numbers = #tpu.dot_dimension_numbers<[1], [0], [0], [1], [0, 0, 1, 1], [], []>} : vector<32x64xf32>, vector<64x32xf32>, vector<32x32xf32> -> vector<32x32xf32>
    %c0_3 = arith.constant 0 : index
    %c0_4 = arith.constant 0 : index
    %3 = vector.load %arg4[%c0_3, %c0_4] : memref<32x32xf32, #tpu.memory_space<vmem>>, vector<32x32xf32>
    %4 = arith.addf %2, %3 : vector<32x32xf32>
    %c0_5 = arith.constant 0 : index
    %c0_6 = arith.constant 0 : index
    %5 = vector.load %arg5[%c0_5, %c0_6] : memref<32x32xf32, #tpu.memory_space<vmem>>, vector<32x32xf32>
    tpu.vector_store %arg5[%c0_5, %c0_6], %4 {strides = array<i32>} : memref<32x32xf32, #tpu.memory_space<vmem>>, vector<32x32xf32>,
    return
  }
  func.func @transform_0(%arg0: i32, %arg1: i32) -> (i32, i32) {
    %c0_i32 = arith.constant 0 : i32
    %c0_i32_0 = arith.constant 0 : i32
    return %arg1, %c0_i32 : i32, i32
  }
  func.func @transform_1(%arg0: i32, %arg1: i32) -> (i32, i32) {
    %c0_i32 = arith.constant 0 : i32
    %c0_i32_0 = arith.constant 0 : i32
    return %c0_i32, %arg0 : i32, i32
  }
  func.func @transform_2(%arg0: i32, %arg1: i32) -> (i32, i32) {
    %c0_i32 = arith.constant 0 : i32
    %c0_i32_0 = arith.constant 0 : i32
    return %c0_i32, %arg0 : i32, i32
  }
  func.func @transform_3(%arg0: i32, %arg1: i32) -> (i32, i32) {
    %c0_i32 = arith.constant 0 : i32
    return %arg1, %arg0 : i32, i32
  }
}

</mosaic_0001>

<bundles_post_ra>
// kernel: tpu_custom_call.1
= control target key start
LH: loop header
LB: loop body
LE: loop exit
PB: predicated region body
PF: predicated region fallthrough
CT: control target
= control target key end

     0   :  { %s231_s0 = inlined_call_operand.vmem [shape: f32[32,64], index: 0, kind: input, shape index: {}]   ;;  %s232_s1 = inlined_call_operand.vmem [shape: f32[64,32], index: 1, kind: input, shape index: {}]   ;;  %s233_s2 = inlined_call_operand.vmem [shape: f32[32,32], index: 2, kind: input, shape index: {}]   ;;  %s234_s3 = inlined_call_operand.hbm [shape: f32[32,32], index: 3, kind: output, shape index: {}]  }
   0x1   :  { %v26_v0 = vld [vmem:[%s232_s1 + $0x38] sm:$0xff]  ;;  %v25_v1 = vld [vmem:[%s232_s1 + $0x30] sm:$0xff]  ;;  %v24_v2 = vld [vmem:[%s232_s1 + $0x28] sm:$0xff] }
   0x2   :  { %101 = vmatpush.msra.mxu2 %v26_v0  ;;  %102 = vmatpush.msra.mxu3 %v26_v0  ;;  %v23_v3 = vld [vmem:[%s232_s1 + $0x20] sm:$0xff] }
   0x3   :  { %52 = vmatpush.msra.mxu0 %v26_v0  ;;  %100 = vmatpush.msra.mxu1 %v26_v0 }
   0x4   :  { %104 = vmatpush.msra.mxu2 %v25_v1  ;;  %105 = vmatpush.msra.mxu3 %v25_v1 }
   0x5   :  { %53 = vmatpush.msra.mxu0 %v25_v1  ;;  %103 = vmatpush.msra.mxu1 %v25_v1 }
   0x6   :  { %8 = vsyncpa [#allocation3], 0  ;;  %107 = vmatpush.msra.mxu2 %v24_v2  ;;  %108 = vmatpush.msra.mxu3 %v24_v2  ;;  %v22_v4 = vld [vmem:[%s232_s1 + $0x18] sm:$0xff]  ;;  %v21_v5 = vld [vmem:[%s232_s1 + $0x10] sm:$0xff]  ;;  %vm31_vm0 = vcmask 523264   ;;  %vm73_vm1 = vcmask 261120  }
   0x7   :  { %54 = vmatpush.msra.mxu0 %v24_v2  ;;  %106 = vmatpush.msra.mxu1 %v24_v2  ;;  %v20_v6 = vld [vmem:[%s232_s1 + $0x8] sm:$0xff]  ;;  %v19_v7 = vld [vmem:[%s232_s1] sm:$0xff]  ;;  %v17_v8 = vld [vmem:[%s231_s0 + $0x10] sm:$0xff]  ;;  %s153_s15 = smov [#allocation2]   ;;  %s84_s19 = sshll.u32 %s234_s3, 4  ;;  %s85_s19 = int_to_ptr.hbm [resolvable:$true] %s84_s19 }
   0x8   :  { %110 = vmatpush.msra.mxu2 %v23_v3  ;;  %111 = vmatpush.msra.mxu3 %v23_v3  ;;  %v18_v9 = vld [vmem:[%s231_s0 + $0x18] sm:$0xff]  ;;  %v15_v10 = vld [vmem:[%s231_s0] sm:$0xff]  ;;  %v16_v11 = vld [vmem:[%s231_s0 + $0x8] sm:$0xff]  ;;  %s82_s16 = sshll.u32 %s153_s15, 4  ;;  %s155_s20 = smov 8   ;;  %s83_s16 = int_to_ptr.vmem [resolvable:$true] %s82_s16 }
   0x9   :  { %55 = vmatpush.msra.mxu0 %v23_v3  ;;  %109 = vmatpush.msra.mxu1 %v23_v3  ;;  %v27_v12 = vld [vmem:[%s233_s2] sm:$0xff]  ;;  %v28_v13 = vld [vmem:[%s233_s2 + $0x8] sm:$0xff]  ;;  %v29_v18 = vld [vmem:[%s233_s2 + $0x10] sm:$0xff] }
   0xa   :  { %113 = vmatpush.msra.mxu2 %v22_v4  ;;  %114 = vmatpush.msra.mxu3 %v22_v4  ;;  %v30_v19 = vld [vmem:[%s233_s2 + $0x18] sm:$0xff]  ;;  %s154_s2 = smov 128  }
   0xb   :  { %56 = vmatpush.msra.mxu0 %v22_v4  ;;  %112 = vmatpush.msra.mxu1 %v22_v4 }
   0xc   :  { %116 = vmatpush.msra.mxu2 %v21_v5  ;;  %117 = vmatpush.msra.mxu3 %v21_v5 }
   0xd   :  { %57 = vmatpush.msra.mxu0 %v21_v5  ;;  %115 = vmatpush.msra.mxu1 %v21_v5 }
   0xe   :  { %119 = vmatpush.msra.mxu2 %v20_v6  ;;  %120 = vmatpush.msra.mxu3 %v20_v6 }
   0xf   :  { %58 = vmatpush.msra.mxu0 %v20_v6  ;;  %118 = vmatpush.msra.mxu1 %v20_v6 }
  0x10   :  { %122 = vmatpush.msra.mxu2 %v19_v7  ;;  %123 = vmatpush.msra.mxu3 %v19_v7 }
  0x11   :  { %98 = vmatmul.msk.f32.vlgmr.msra.gmra.mxu2 %vm31_vm0, %v17_v8  ;;  %99 = vmatmul.msk.f32.vlgmr.msra.gmra.mxu3 %vm31_vm0, %v18_v9 }
  0x12   :  { %59 = vmatpush.msra.mxu0 %v19_v7  ;;  %121 = vmatpush.msra.mxu1 %v19_v7 }
  0x13   :  { %96 = vmatmul.msk.f32.vlgmr.msra.gmra.mxu0 %vm31_vm0, %v15_v10  ;;  %97 = vmatmul.msk.f32.vlgmr.msra.gmra.mxu1 %vm31_vm0, %v16_v11 }
  0x90   :  { %v61_v14 = vpop.f32.mrf.mxu0  ;;  %v64_v15 = vpop.f32.mrf.mxu1 }
  0x91   :  { %v62_v16 = vadd.f32 %v61_v14, %v27_v12  ;;  %v65_v17 = vadd.f32 %v64_v15, %v28_v13 }
  0x93   :  { %74 = vst.msk [vmem:[#allocation2] sm:$0xff] %vm73_vm1, %v62_v16 }
  0x94   :  { %75 = vst.msk [vmem:[#allocation2 + $0x8] sm:$0xff] %vm73_vm1, %v65_v17  ;;  %v67_v20 = vpop.f32.mrf.mxu2  ;;  %v70_v21 = vpop.f32.mrf.mxu3 }
  0x95   :  { %v68_v22 = vadd.f32 %v67_v20, %v29_v18  ;;  %v71_v23 = vadd.f32 %v70_v21, %v30_v19 }
  0x97   :  { %76 = vst.msk [vmem:[#allocation2 + $0x10] sm:$0xff] %vm73_vm1, %v68_v22 }
  0x98   :  { %77 = vst.msk [vmem:[#allocation2 + $0x18] sm:$0xff] %vm73_vm1, %v71_v23 }
  0x99   :  { %90 = dma.vmem_to_hbm [thread:$0]  %s83_s16, 512, %s85_s19, [#allocation3], %s154_s2, %s154_s2, %s155_s20  }
  0x9a   :  { %151 = dma.done.wait [#allocation3], 512  }
  0x9b   :  { %152 = vsyncadd [#allocation3], 4294966784 }
  0x9c   :  { %95 = vsyncpa [#allocation3], 1 }

</bundles_post_ra>
